<compile_context>
chip_gen: v7x
topology: tpu7x:2x2x1
jax: 0.10.0
libtpu: 0.0.40
codegen_flags: <defaults>
</compile_context>

<pallas_src>
import functools
import math

import jax
import jax.numpy as jnp
from jax.experimental import pallas as pl
from jax.experimental.pallas import tpu as pltpu


def _round_up(x, m):
    return -(-x // m) * m


def _rebnconv_kernel(x_ref, w_ref, s_ref, b_ref, o_ref, im_ref, *col_scratch,
                     H, W, Cin, Cout, d, thw, lead, win, kfold):
    # x_ref : (1, Cin, H*W)   raw input image (original dtype), resident per batch element
    # w_ref : (Cout, 9*Cin) bf16 [kfold path]   or (9, Cout, Cin) bf16 [per-tap path]
    # s_ref : (Cout, 1) f32   folded BN scale
    # b_ref : (Cout, 1) f32   folded BN bias (includes conv bias)
    # o_ref : (1, Cout, thw)  output row tile (lane dim thw is a multiple of 128)
    # im_ref: (Cin, flat_len) bf16  zero-padded flat image scratch (built at t == 0)
    # col_scratch[0] (kfold only): (9*Cin, thw) bf16 im2col buffer
    t = pl.program_id(1)

    # ---- once per image: zero-pad + bf16-cast into the flat padded layout.  Real pixels
    #      start at the 128-aligned offset `lead`, so this store and every window load
    #      below are lane-aligned.  The f32 input makes exactly one HBM->VMEM trip. ----
    @pl.when(t == 0)
    def _():
        im_ref[...] = jnp.zeros_like(im_ref)
        im_ref[:, lead:lead + H * W] = x_ref[0].astype(im_ref.dtype)

    # ---- per row tile: 128-aligned dynamic halo window over the padded flat image ----
    start = pl.multiple_of(t * thw, 128)            # thw is a multiple of 128
    xw = im_ref[:, pl.ds(start, win)]               # (Cin, win) bf16

    # column-validity masks (emulate zero padding at the left/right image borders),
    # built in-kernel from an iota -> no extra operand / DMA.
    q = jax.lax.broadcasted_iota(jnp.int32, (1, thw), 1)
    colw = q % W
    mlo = (colw >= d).astype(xw.dtype)              # left  tap stays inside its row
    mhi = (colw < W - d).astype(xw.dtype)           # right tap stays inside its row

    def tap(kh, kw):
        s = lead + (kh - 1) * d * W + (kw - 1) * d  # static in-window offset of this tap
        v = xw[:, s:s + thw]                        # (Cin, thw) bf16 slice
        if kw == 0:
            v = v * mlo
        elif kw == 2:
            v = v * mhi
        return v

    if kfold:
        # taps folded into the contraction dim: one MXU dot with K = 9*Cin
        col_ref = col_scratch[0]
        for kh in range(3):
            for kw in range(3):
                k = kh * 3 + kw
                col_ref[k * Cin:(k + 1) * Cin, :] = tap(kh, kw)
        acc = jax.lax.dot_general(
            w_ref[...], col_ref[...],
            dimension_numbers=(((1,), (0,)), ((), ())),
            preferred_element_type=jnp.float32)      # (Cout, thw) f32
    else:
        # tiny-Cin stem: nine small dots, f32 register accumulation (MXU is idle anyway)
        acc = jnp.zeros((Cout, thw), jnp.float32)
        for kh in range(3):
            for kw in range(3):
                k = kh * 3 + kw
                acc = acc + jax.lax.dot_general(
                    w_ref[k], tap(kh, kw),
                    dimension_numbers=(((1,), (0,)), ((), ())),
                    preferred_element_type=jnp.float32)

    out = acc * s_ref[...] + b_ref[...]              # fused BatchNorm (eval) affine
    o_ref[0] = jnp.maximum(out, 0.0).astype(o_ref.dtype)   # ReLU


def _vmem_capacity_bytes():
    try:
        return int(pltpu.get_tpu_info().vmem_capacity_bytes)
    except Exception:
        return 64 << 20                              # conservative (v7x-sized) fallback


def _pick_tile_h(N, H, W, Cin, Cout, d, kfold, requested, vmem_cap):
    """Rows per tile. tile_h*W must be a multiple of 128 so output stores are lane-dense."""
    base = 128 // math.gcd(W, 128)
    if requested is None:
        budget = min(16 << 20, vmem_cap // 8)        # per-tile working-set budget
        per_row = W * (2 * Cin * 2                   # window + tap temporaries (bf16)
                       + (9 * Cin * 2 if kfold else 0)   # im2col scratch (bf16)
                       + 4 * Cout * 4)               # acc / bn + double-buffered out (f32)
        requested = max(base, budget // max(per_row, 1))
    tile_h = max(base, min(int(requested), max(H, base)))
    tile_h = max(base, (tile_h // base) * base)
    # prefer a tile height that divides H (no wasted rows to compute & crop)
    cand = tile_h
    while cand > base and H % cand != 0:
        cand -= base
    if cand >= base and H % cand == 0:
        tile_h = cand
    # single-image inputs: split rows so multi-TensorCore parts have >= 2 grid steps
    if N == 1 and tile_h >= H and H > base:
        tile_h = max(base, (((H + 1) // 2) // base) * base)
    return tile_h


def rebnconv_pallas(x_nchw, w_oihw, conv_bias, gamma, beta, run_mean, run_var,
                    dirate=1, eps=1e-5, tile_h=None):
    N, Cin, H, W = x_nchw.shape
    Cout = w_oihw.shape[0]
    d = int(dirate)

    # K-fold the 9 taps into the MXU contraction dim when Cin is bf16 sublane-aligned.
    kfold = (Cin % 16 == 0)

    vmem_cap = _vmem_capacity_bytes()
    tile_h = _pick_tile_h(N, H, W, Cin, Cout, d, kfold, tile_h, vmem_cap)
    nT = -(-H // tile_h)
    Hp = nT * tile_h
    thw = tile_h * W                                 # lane dim of every output block
    lead = _round_up(d * W + d, 128)                 # 128-aligned start of the real pixels
    win = _round_up(lead + thw + d * W + d, 128)     # 128-multiple halo window per row tile
    flat_len = (nT - 1) * thw + win                  # padded flat image length (VMEM)

    # ---- BatchNorm (inference, running stats) folded into a per-channel affine (f32) ----
    scale = (gamma / jnp.sqrt(run_var + eps)).astype(jnp.float32)
    bias = (beta + scale * (conv_bias - run_mean)).astype(jnp.float32)
    scale2d = scale.reshape(Cout, 1)
    bias2d = bias.reshape(Cout, 1)

    # ---- weights in bf16, laid out for the chosen folding ----
    if kfold:
        wk = jnp.transpose(w_oihw, (0, 2, 3, 1)).reshape(Cout, 9 * Cin).astype(jnp.bfloat16)
    else:
        wk = jnp.transpose(w_oihw, (2, 3, 0, 1)).reshape(9, Cout, Cin).astype(jnp.bfloat16)
    w_idx = (lambda n, t: (0,) * wk.ndim)

    # only wrapper-side input op is a free (bitcast) reshape; cast + zero padding happen
    # inside the kernel, so the input makes a single HBM read.
    x_flat = x_nchw.reshape(N, Cin, H * W)

    kernel = functools.partial(_rebnconv_kernel, H=H, W=W, Cin=Cin, Cout=Cout, d=d,
                               thw=thw, lead=lead, win=win, kfold=kfold)

    scratch = [pltpu.VMEM((Cin, flat_len), jnp.bfloat16)]
    if kfold:
        scratch.append(pltpu.VMEM((9 * Cin, thw), jnp.bfloat16))

    # explicit VMEM budget from actual block / scratch / temporary sizes, capped at 75% of
    # this generation's physical VMEM (v5e/v6e 128 MiB, v7x 64 MiB).
    need = (2 * Cin * H * W * x_nchw.dtype.itemsize      # resident input block (x2 buffers)
            + 2 * wk.size * 2 + 4 * Cout * 4             # weights / scale / bias
            + 2 * Cout * thw * 4                         # output block (x2 buffers)
            + Cin * flat_len * 2                         # padded flat image scratch
            + (9 * Cin * thw * 2 if kfold else 0)        # im2col scratch
            + Cin * win * 2 + 3 * Cin * thw * 2          # window + tap temporaries
            + 2 * Cout * thw * 4 + 2 * thw * 4)          # acc / bn result / masks
    vmem_limit = int(min(max(2 * need, 16 << 20), (vmem_cap * 3) // 4))
    # TODO(synk): for images too large for the resident-per-batch layout, fall back to a
    # halo-window DMA path (memory_space=pl.ANY + pltpu.make_async_copy) instead.

    cost = pl.CostEstimate(
        flops=2 * 9 * Cin * Cout * N * Hp * W,
        transcendentals=0,
        bytes_accessed=(N * Cin * H * W * x_nchw.dtype.itemsize
                        + wk.size * 2
                        + N * Cout * Hp * W * x_nchw.dtype.itemsize))

    out_flat = pl.pallas_call(
        kernel,
        out_shape=jax.ShapeDtypeStruct((N, Cout, Hp * W), x_nchw.dtype),
        grid_spec=pltpu.PrefetchScalarGridSpec(
            num_scalar_prefetch=0,
            grid=(N, nT),
            in_specs=[
                # whole image per batch element stays VMEM-resident across its row tiles
                pl.BlockSpec((1, Cin, H * W), lambda n, t: (n, 0, 0)),
                pl.BlockSpec(wk.shape, w_idx),
                pl.BlockSpec((Cout, 1), lambda n, t: (0, 0)),
                pl.BlockSpec((Cout, 1), lambda n, t: (0, 0)),
            ],
            out_specs=pl.BlockSpec((1, Cout, thw), lambda n, t: (n, 0, t)),
            scratch_shapes=scratch,
        ),
        compiler_params=pltpu.CompilerParams(
            # row-tile axis stays "arbitrary": the padded-image scratch is built at t == 0
            # and reused by the following tiles of the same image on the same core.
            dimension_semantics=("parallel", "arbitrary"),
            vmem_limit_bytes=vmem_limit,
        ),
        cost_estimate=cost,
    )(x_flat, wk, scale2d, bias2d)

    out = out_flat.reshape(N, Cout, Hp, W)
    if Hp != H:
        out = out[:, :, :H, :]
    return out


def rebnconv_reference(x, w, b, gamma, beta, mean, var, dirate=1, eps=1e-5):
    d = dirate
    conv = jax.lax.conv_general_dilated(
        x, w, window_strides=(1, 1), padding=[(d, d), (d, d)],
        rhs_dilation=(d, d), dimension_numbers=("NCHW", "OIHW", "NCHW"),
        precision=jax.lax.Precision.HIGHEST)
    conv = conv + b.reshape(1, -1, 1, 1)
    bn = (conv - mean.reshape(1, -1, 1, 1)) / jnp.sqrt(var.reshape(1, -1, 1, 1) + eps)
    bn = bn * gamma.reshape(1, -1, 1, 1) + beta.reshape(1, -1, 1, 1)
    return jnp.maximum(bn, 0.0)


def _make_params(key, N, Cin, Cout, H, W):
    ks = jax.random.split(key, 7)
    x = jax.random.normal(ks[0], (N, Cin, H, W), jnp.float32)
    w = jax.random.normal(ks[1], (Cout, Cin, 3, 3), jnp.float32) * 0.1   # Conv2d weight
    b = jax.random.normal(ks[2], (Cout,), jnp.float32) * 0.1             # Conv2d bias
    gamma = 1.0 + 0.1 * jax.random.normal(ks[3], (Cout,), jnp.float32)   # BN weight
    beta = 0.1 * jax.random.normal(ks[4], (Cout,), jnp.float32)          # BN bias
    mean = 0.1 * jax.random.normal(ks[5], (Cout,), jnp.float32)          # BN running_mean
    var = 0.5 + jnp.abs(jax.random.normal(ks[6], (Cout,), jnp.float32))  # BN running_var
    return x, w, b, gamma, beta, mean, var


if __name__ == "__main__":
    key = jax.random.PRNGKey(0)
    # (N, Cin, Cout, H, W, dirate, tile_h):
    #   small-Cin stem path (single tile, explicit 2-tile halo path, dilation 2) and a
    #   Cin % 16 == 0 config exercising the K-folded im2col path + the N==1 row split.
    configs = [
        (2, 4, 8, 16, 16, 1, None),
        (2, 4, 8, 16, 16, 1, 8),
        (2, 4, 8, 16, 16, 2, None),
        (1, 16, 16, 16, 16, 1, None),
    ]
    for i, (N, Cin, Cout, H, W, dirate, th) in enumerate(configs):
        key, sub = jax.random.split(key)
        x, w, b, gamma, beta, mean, var = _make_params(sub, N, Cin, Cout, H, W)

        # bf16-quantized-input reference (apples-to-apples with the bf16 MXU path)
        xq = x.astype(jnp.bfloat16).astype(jnp.float32)
        wq = w.astype(jnp.bfloat16).astype(jnp.float32)
        ref_q = rebnconv_reference(xq, wq, b, gamma, beta, mean, var, dirate)
        ref_f = rebnconv_reference(x, w, b, gamma, beta, mean, var, dirate)

        out = rebnconv_pallas(x, w, b, gamma, beta, mean, var, dirate=dirate, tile_h=th)
        out = jax.block_until_ready(out)

        assert out.shape == (N, Cout, H, W), f"config {i}: bad shape {out.shape}"
        err_q = float(jnp.max(jnp.abs(out - ref_q)))
        err_f = float(jnp.max(jnp.abs(out - ref_f)))
        assert err_q < 2e-3, f"config {i}: mismatch vs bf16-quantized reference: {err_q}"
        assert err_f < 1e-1, f"config {i}: mismatch vs f32 reference: {err_f}"

    print("KERNEL_OK")
</pallas_src>

<mosaic_0001>
module attributes {stable_mosaic.version = 11 : i64} {
  func.func @_rebnconv_kernel(%arg0: i32, %arg1: i32, %arg2: memref<1x4x256xf32, #tpu.memory_space<vmem>>, %arg3: memref<9x8x4xbf16, #tpu.memory_space<vmem>>, %arg4: memref<8x1xf32, #tpu.memory_space<vmem>>, %arg5: memref<8x1xf32, #tpu.memory_space<vmem>>, %arg6: memref<1x8x256xf32, #tpu.memory_space<vmem>>, %arg7: memref<4x512xbf16, #tpu.memory_space<vmem>>) attributes {dimension_semantics = [#tpu.dimension_semantics<parallel>, #tpu.dimension_semantics<arbitrary>], iteration_bounds = array<i64: 2, 1>, scalar_prefetch = 0 : i64, scratch_operands = 1 : i64, tpu.core_type = #tpu.core_type<tc>, window_params = [{transform_indices = @transform_0, window_bounds = array<i64: 1, 4, 256>}, {pipeline_mode = #tpu.pipeline_mode<synchronous>, transform_indices = @transform_1, window_bounds = array<i64: 9, 8, 4>}, {pipeline_mode = #tpu.pipeline_mode<synchronous>, transform_indices = @transform_2, window_bounds = array<i64: 8, 1>}, {pipeline_mode = #tpu.pipeline_mode<synchronous>, transform_indices = @transform_3, window_bounds = array<i64: 8, 1>}, {transform_indices = @transform_4, window_bounds = array<i64: 1, 8, 256>}]} {
    %c0_i32 = arith.constant 0 : i32
    %0 = arith.cmpi eq, %arg1, %c0_i32 : i32
    %1 = arith.extui %0 : i1 to i32
    %c0_i32_0 = arith.constant 0 : i32
    %2 = arith.cmpi ne, %1, %c0_i32_0 : i32
    scf.if %2 {
      %cst_42 = arith.constant 0.000000e+00 : bf16
      %103 = vector.broadcast %cst_42 : bf16 to vector<4x512xbf16>
      %c0_43 = arith.constant 0 : index
      %c0_44 = arith.constant 0 : index
      %104 = vector.load %arg7[%c0_43, %c0_44] : memref<4x512xbf16, #tpu.memory_space<vmem>>, vector<4x512xbf16>
      tpu.vector_store %arg7[%c0_43, %c0_44], %103 {strides = array<i32>} : memref<4x512xbf16, #tpu.memory_space<vmem>>, vector<4x512xbf16>,
      %c0_45 = arith.constant 0 : index
      %c0_46 = arith.constant 0 : index
      %c0_47 = arith.constant 0 : index
      %105 = vector.load %arg2[%c0_45, %c0_46, %c0_47] : memref<1x4x256xf32, #tpu.memory_space<vmem>>, vector<1x4x256xf32>
      %106 = vector.shape_cast %105 : vector<1x4x256xf32> to vector<4x256xf32>
      %107 = arith.truncf %106 : vector<4x256xf32> to vector<4x256xbf16>
      %c0_48 = arith.constant 0 : index
      %c128 = arith.constant 128 : index
      %108 = vector.load %arg7[%c0_48, %c128] : memref<4x512xbf16, #tpu.memory_space<vmem>>, vector<4x256xbf16>
      tpu.vector_store %arg7[%c0_48, %c128], %107 {strides = array<i32>} : memref<4x512xbf16, #tpu.memory_space<vmem>>, vector<4x256xbf16>,
    } else {
    }
    %c256_i32 = arith.constant 256 : i32
    %3 = arith.muli %arg1, %c256_i32 : i32
    %4 = tpu.assume_multiple %3, 128 : i32
    %c0 = arith.constant 0 : index
    %5 = arith.index_cast %4 : i32 to index
    %6 = vector.load %arg7[%c0, %5] : memref<4x512xbf16, #tpu.memory_space<vmem>>, vector<4x512xbf16>
    %7 = tpu.iota {dimensions = array<i32: 1>} : vector<1x256xi32>
    %c16_i32 = arith.constant 16 : i32
    %c0_i32_1 = arith.constant 0 : i32
    %8 = arith.cmpi eq, %c16_i32, %c0_i32_1 : i32
    %c1_i32 = arith.constant 1 : i32
    %9 = arith.select %8, %c1_i32, %c16_i32 : i32
    %10 = vector.broadcast %9 : i32 to vector<1x256xi32>
    %11 = arith.remsi %7, %10 : vector<1x256xi32>
    %c0_i32_2 = arith.constant 0 : i32
    %12 = vector.broadcast %c0_i32_2 : i32 to vector<1x256xi32>
    %13 = arith.cmpi ne, %11, %12 : vector<1x256xi32>
    %c0_i32_3 = arith.constant 0 : i32
    %14 = vector.broadcast %c0_i32_3 : i32 to vector<1x256xi32>
    %15 = arith.cmpi slt, %11, %14 : vector<1x256xi32>
    %c0_i32_4 = arith.constant 0 : i32
    %16 = arith.cmpi slt, %9, %c0_i32_4 : i32
    %17 = vector.broadcast %16 : i1 to vector<1x256xi1>
    %18 = vector.broadcast %17 : vector<1x256xi1> to vector<1x256xi1>
    %19 = arith.xori %15, %18 : vector<1x256xi1>
    %20 = arith.andi %19, %13 : vector<1x256xi1>
    %21 = vector.broadcast %9 : i32 to vector<1x256xi32>
    %22 = arith.addi %11, %21 : vector<1x256xi32>
    %23 = arith.select %20, %22, %11 : vector<1x256xi1>, vector<1x256xi32>
    %c1_i32_5 = arith.constant 1 : i32
    %24 = vector.broadcast %c1_i32_5 : i32 to vector<1x256xi32>
    %25 = arith.cmpi sge, %23, %24 : vector<1x256xi32>
    %26 = arith.extui %25 : vector<1x256xi1> to vector<1x256xi32>
    %27 = arith.sitofp %26 : vector<1x256xi32> to vector<1x256xf32>
    %28 = arith.truncf %27 : vector<1x256xf32> to vector<1x256xbf16>
    %c15_i32 = arith.constant 15 : i32
    %29 = vector.broadcast %c15_i32 : i32 to vector<1x256xi32>
    %30 = arith.cmpi slt, %23, %29 : vector<1x256xi32>
    %31 = arith.extui %30 : vector<1x256xi1> to vector<1x256xi32>
    %32 = arith.sitofp %31 : vector<1x256xi32> to vector<1x256xf32>
    %33 = arith.truncf %32 : vector<1x256xf32> to vector<1x256xbf16>
    %cst = arith.constant 0.000000e+00 : f32
    %34 = vector.broadcast %cst : f32 to vector<8x256xf32>
    %c0_6 = arith.constant 0 : index
    %c0_7 = arith.constant 0 : index
    %c0_8 = arith.constant 0 : index
    %35 = vector.load %arg3[%c0_6, %c0_7, %c0_8] : memref<9x8x4xbf16, #tpu.memory_space<vmem>>, vector<1x8x4xbf16>
    %36 = vector.shape_cast %35 : vector<1x8x4xbf16> to vector<8x4xbf16>
    %37 = vector.extract_strided_slice %6 {offsets = [0, 111], sizes = [4, 256], strides = [1, 1]} : vector<4x512xbf16> to vector<4x256xbf16>
    %38 = vector.broadcast %28 : vector<1x256xbf16> to vector<4x256xbf16>
    %39 = arith.mulf %37, %38 : vector<4x256xbf16>
    %cst_9 = arith.constant dense<0.000000e+00> : vector<8x256xf32>
    %40 = tpu.matmul %36, %39, %cst_9 {dimension_numbers = #tpu.dot_dimension_numbers<[1], [0], [0], [1], [0, 0, 1, 1], [], []>} : vector<8x4xbf16>, vector<4x256xbf16>, vector<8x256xf32> -> vector<8x256xf32>
    %41 = arith.addf %34, %40 : vector<8x256xf32>
    %c1 = arith.constant 1 : index
    %c0_10 = arith.constant 0 : index
    %c0_11 = arith.constant 0 : index
    %42 = vector.load %arg3[%c1, %c0_10, %c0_11] : memref<9x8x4xbf16, #tpu.memory_space<vmem>>, vector<1x8x4xbf16>
    %43 = vector.shape_cast %42 : vector<1x8x4xbf16> to vector<8x4xbf16>
    %44 = vector.extract_strided_slice %6 {offsets = [0, 112], sizes = [4, 256], strides = [1, 1]} : vector<4x512xbf16> to vector<4x256xbf16>
    %cst_12 = arith.constant dense<0.000000e+00> : vector<8x256xf32>
    %45 = tpu.matmul %43, %44, %cst_12 {dimension_numbers = #tpu.dot_dimension_numbers<[1], [0], [0], [1], [0, 0, 1, 1], [], []>} : vector<8x4xbf16>, vector<4x256xbf16>, vector<8x256xf32> -> vector<8x256xf32>
    %46 = arith.addf %41, %45 : vector<8x256xf32>
    %c2 = arith.constant 2 : index
    %c0_13 = arith.constant 0 : index
    %c0_14 = arith.constant 0 : index
    %47 = vector.load %arg3[%c2, %c0_13, %c0_14] : memref<9x8x4xbf16, #tpu.memory_space<vmem>>, vector<1x8x4xbf16>
    %48 = vector.shape_cast %47 : vector<1x8x4xbf16> to vector<8x4xbf16>
    %49 = vector.extract_strided_slice %6 {offsets = [0, 113], sizes = [4, 256], strides = [1, 1]} : vector<4x512xbf16> to vector<4x256xbf16>
    %50 = vector.broadcast %33 : vector<1x256xbf16> to vector<4x256xbf16>
    %51 = arith.mulf %49, %50 : vector<4x256xbf16>
    %cst_15 = arith.constant dense<0.000000e+00> : vector<8x256xf32>
    %52 = tpu.matmul %48, %51, %cst_15 {dimension_numbers = #tpu.dot_dimension_numbers<[1], [0], [0], [1], [0, 0, 1, 1], [], []>} : vector<8x4xbf16>, vector<4x256xbf16>, vector<8x256xf32> -> vector<8x256xf32>
    %53 = arith.addf %46, %52 : vector<8x256xf32>
    %c3 = arith.constant 3 : index
    %c0_16 = arith.constant 0 : index
    %c0_17 = arith.constant 0 : index
    %54 = vector.load %arg3[%c3, %c0_16, %c0_17] : memref<9x8x4xbf16, #tpu.memory_space<vmem>>, vector<1x8x4xbf16>
    %55 = vector.shape_cast %54 : vector<1x8x4xbf16> to vector<8x4xbf16>
    %56 = vector.extract_strided_slice %6 {offsets = [0, 127], sizes = [4, 256], strides = [1, 1]} : vector<4x512xbf16> to vector<4x256xbf16>
    %57 = vector.broadcast %28 : vector<1x256xbf16> to vector<4x256xbf16>
    %58 = arith.mulf %56, %57 : vector<4x256xbf16>
    %cst_18 = arith.constant dense<0.000000e+00> : vector<8x256xf32>
    %59 = tpu.matmul %55, %58, %cst_18 {dimension_numbers = #tpu.dot_dimension_numbers<[1], [0], [0], [1], [0, 0, 1, 1], [], []>} : vector<8x4xbf16>, vector<4x256xbf16>, vector<8x256xf32> -> vector<8x256xf32>
    %60 = arith.addf %53, %59 : vector<8x256xf32>
    %c4 = arith.constant 4 : index
    %c0_19 = arith.constant 0 : index
    %c0_20 = arith.constant 0 : index
    %61 = vector.load %arg3[%c4, %c0_19, %c0_20] : memref<9x8x4xbf16, #tpu.memory_space<vmem>>, vector<1x8x4xbf16>
    %62 = vector.shape_cast %61 : vector<1x8x4xbf16> to vector<8x4xbf16>
    %63 = vector.extract_strided_slice %6 {offsets = [0, 128], sizes = [4, 256], strides = [1, 1]} : vector<4x512xbf16> to vector<4x256xbf16>
    %cst_21 = arith.constant dense<0.000000e+00> : vector<8x256xf32>
    %64 = tpu.matmul %62, %63, %cst_21 {dimension_numbers = #tpu.dot_dimension_numbers<[1], [0], [0], [1], [0, 0, 1, 1], [], []>} : vector<8x4xbf16>, vector<4x256xbf16>, vector<8x256xf32> -> vector<8x256xf32>
    %65 = arith.addf %60, %64 : vector<8x256xf32>
    %c5 = arith.constant 5 : index
    %c0_22 = arith.constant 0 : index
    %c0_23 = arith.constant 0 : index
    %66 = vector.load %arg3[%c5, %c0_22, %c0_23] : memref<9x8x4xbf16, #tpu.memory_space<vmem>>, vector<1x8x4xbf16>
    %67 = vector.shape_cast %66 : vector<1x8x4xbf16> to vector<8x4xbf16>
    %68 = vector.extract_strided_slice %6 {offsets = [0, 129], sizes = [4, 256], strides = [1, 1]} : vector<4x512xbf16> to vector<4x256xbf16>
    %69 = vector.broadcast %33 : vector<1x256xbf16> to vector<4x256xbf16>
    %70 = arith.mulf %68, %69 : vector<4x256xbf16>
    %cst_24 = arith.constant dense<0.000000e+00> : vector<8x256xf32>
    %71 = tpu.matmul %67, %70, %cst_24 {dimension_numbers = #tpu.dot_dimension_numbers<[1], [0], [0], [1], [0, 0, 1, 1], [], []>} : vector<8x4xbf16>, vector<4x256xbf16>, vector<8x256xf32> -> vector<8x256xf32>
    %72 = arith.addf %65, %71 : vector<8x256xf32>
    %c6 = arith.constant 6 : index
    %c0_25 = arith.constant 0 : index
    %c0_26 = arith.constant 0 : index
    %73 = vector.load %arg3[%c6, %c0_25, %c0_26] : memref<9x8x4xbf16, #tpu.memory_space<vmem>>, vector<1x8x4xbf16>
    %74 = vector.shape_cast %73 : vector<1x8x4xbf16> to vector<8x4xbf16>
    %75 = vector.extract_strided_slice %6 {offsets = [0, 143], sizes = [4, 256], strides = [1, 1]} : vector<4x512xbf16> to vector<4x256xbf16>
    %76 = vector.broadcast %28 : vector<1x256xbf16> to vector<4x256xbf16>
    %77 = arith.mulf %75, %76 : vector<4x256xbf16>
    %cst_27 = arith.constant dense<0.000000e+00> : vector<8x256xf32>
    %78 = tpu.matmul %74, %77, %cst_27 {dimension_numbers = #tpu.dot_dimension_numbers<[1], [0], [0], [1], [0, 0, 1, 1], [], []>} : vector<8x4xbf16>, vector<4x256xbf16>, vector<8x256xf32> -> vector<8x256xf32>
    %79 = arith.addf %72, %78 : vector<8x256xf32>
    %c7 = arith.constant 7 : index
    %c0_28 = arith.constant 0 : index
    %c0_29 = arith.constant 0 : index
    %80 = vector.load %arg3[%c7, %c0_28, %c0_29] : memref<9x8x4xbf16, #tpu.memory_space<vmem>>, vector<1x8x4xbf16>
    %81 = vector.shape_cast %80 : vector<1x8x4xbf16> to vector<8x4xbf16>
    %82 = vector.extract_strided_slice %6 {offsets = [0, 144], sizes = [4, 256], strides = [1, 1]} : vector<4x512xbf16> to vector<4x256xbf16>
    %cst_30 = arith.constant dense<0.000000e+00> : vector<8x256xf32>
    %83 = tpu.matmul %81, %82, %cst_30 {dimension_numbers = #tpu.dot_dimension_numbers<[1], [0], [0], [1], [0, 0, 1, 1], [], []>} : vector<8x4xbf16>, vector<4x256xbf16>, vector<8x256xf32> -> vector<8x256xf32>
    %84 = arith.addf %79, %83 : vector<8x256xf32>
    %c8 = arith.constant 8 : index
    %c0_31 = arith.constant 0 : index
    %c0_32 = arith.constant 0 : index
    %85 = vector.load %arg3[%c8, %c0_31, %c0_32] : memref<9x8x4xbf16, #tpu.memory_space<vmem>>, vector<1x8x4xbf16>
    %86 = vector.shape_cast %85 : vector<1x8x4xbf16> to vector<8x4xbf16>
    %87 = vector.extract_strided_slice %6 {offsets = [0, 145], sizes = [4, 256], strides = [1, 1]} : vector<4x512xbf16> to vector<4x256xbf16>
    %88 = vector.broadcast %33 : vector<1x256xbf16> to vector<4x256xbf16>
    %89 = arith.mulf %87, %88 : vector<4x256xbf16>
    %cst_33 = arith.constant dense<0.000000e+00> : vector<8x256xf32>
    %90 = tpu.matmul %86, %89, %cst_33 {dimension_numbers = #tpu.dot_dimension_numbers<[1], [0], [0], [1], [0, 0, 1, 1], [], []>} : vector<8x4xbf16>, vector<4x256xbf16>, vector<8x256xf32> -> vector<8x256xf32>
    %91 = arith.addf %84, %90 : vector<8x256xf32>
    %c0_34 = arith.constant 0 : index
    %c0_35 = arith.constant 0 : index
    %92 = vector.load %arg4[%c0_34, %c0_35] : memref<8x1xf32, #tpu.memory_space<vmem>>, vector<8x1xf32>
    %93 = vector.broadcast %92 : vector<8x1xf32> to vector<8x256xf32>
    %94 = arith.mulf %91, %93 : vector<8x256xf32>
    %c0_36 = arith.constant 0 : index
    %c0_37 = arith.constant 0 : index
    %95 = vector.load %arg5[%c0_36, %c0_37] : memref<8x1xf32, #tpu.memory_space<vmem>>, vector<8x1xf32>
    %96 = vector.broadcast %95 : vector<8x1xf32> to vector<8x256xf32>
    %97 = arith.addf %94, %96 : vector<8x256xf32>
    %cst_38 = arith.constant 0.000000e+00 : f32
    %98 = vector.broadcast %cst_38 : f32 to vector<8x256xf32>
    %99 = arith.maximumf %97, %98 : vector<8x256xf32>
    %c0_39 = arith.constant 0 : index
    %c0_40 = arith.constant 0 : index
    %c0_41 = arith.constant 0 : index
    %100 = vector.load %arg6[%c0_39, %c0_40, %c0_41] : memref<1x8x256xf32, #tpu.memory_space<vmem>>, vector<1x8x256xf32>
    %101 = vector.shape_cast %100 : vector<1x8x256xf32> to vector<8x256xf32>
    %102 = vector.shape_cast %99 : vector<8x256xf32> to vector<1x8x256xf32>
    tpu.vector_store %arg6[%c0_39, %c0_40, %c0_41], %102 {strides = array<i32>} : memref<1x8x256xf32, #tpu.memory_space<vmem>>, vector<1x8x256xf32>,
    return
  }
  func.func @transform_0(%arg0: i32, %arg1: i32) -> (i32, i32, i32) {
    %c0_i32 = arith.constant 0 : i32
    %c0_i32_0 = arith.constant 0 : i32
    %c0_i32_1 = arith.constant 0 : i32
    return %arg0, %c0_i32, %c0_i32_0 : i32, i32, i32
  }
  func.func @transform_1(%arg0: i32, %arg1: i32) -> (i32, i32, i32) {
    %c0_i32 = arith.constant 0 : i32
    %c0_i32_0 = arith.constant 0 : i32
    %c0_i32_1 = arith.constant 0 : i32
    %c0_i32_2 = arith.constant 0 : i32
    return %c0_i32, %c0_i32_0, %c0_i32_1 : i32, i32, i32
  }
  func.func @transform_2(%arg0: i32, %arg1: i32) -> (i32, i32) {
    %c0_i32 = arith.constant 0 : i32
    %c0_i32_0 = arith.constant 0 : i32
    %c0_i32_1 = arith.constant 0 : i32
    return %c0_i32, %c0_i32_0 : i32, i32
  }
  func.func @transform_3(%arg0: i32, %arg1: i32) -> (i32, i32) {
    %c0_i32 = arith.constant 0 : i32
    %c0_i32_0 = arith.constant 0 : i32
    %c0_i32_1 = arith.constant 0 : i32
    return %c0_i32, %c0_i32_0 : i32, i32
  }
  func.func @transform_4(%arg0: i32, %arg1: i32) -> (i32, i32, i32) {
    %c0_i32 = arith.constant 0 : i32
    %c0_i32_0 = arith.constant 0 : i32
    return %arg0, %c0_i32, %arg1 : i32, i32, i32
  }
}

</mosaic_0001>

<bundles_post_ra>
// kernel: tpu_custom_call.1
= control target key start
LH: loop header
LB: loop body
LE: loop exit
PB: predicated region body
PF: predicated region fallthrough
CT: control target
= control target key end

     0   :  { %9 = vsyncpa [#allocation4], 0  ;;  %s1582_s0 = inlined_call_operand.vmem [shape: f32[2,4,256], index: 0, kind: input, shape index: {}]   ;;  %s1583_s1 = inlined_call_operand.vmem [shape: bf16[9,8,4], index: 1, kind: input, shape index: {}]   ;;  %s1584_s2 = inlined_call_operand.vmem [shape: f32[8,1], index: 2, kind: input, shape index: {}]   ;;  %s1585_s3 = inlined_call_operand.vmem [shape: f32[8,1], index: 3, kind: input, shape index: {}]   ;;  %s1586_s4 = inlined_call_operand.hbm [shape: f32[2,8,256], index: 4, kind: output, shape index: {}]  }
   0x1   :  { %11 = vsyncpa [#allocation4 + $0x1], 0  ;;  %s1347_s15 = smov 0   ;;  %s1349_s16 = smov 0  }
   0x2   :  { %s1351_s17 = smov 0   ;;  %s1353_s18 = smov 0  }
   0x3   :  { %s1355_s19 = smov 0   ;;  %s1357_s20 = smov 0  }
   0x4 LB: > { %s1081_s21 = sadd.s32 4294967295, %s1308_s20   ;;  %s1082_s22 = sadd.s32 4294967294, %s1308_s20   ;;  %s1308_s20 = sphi %s1357_s20, %s17_s20   ;;  %s1304_s19 = sphi %s1355_s19, %s1593_s19   ;;  %s1300_s18 = sphi %s1353_s18, %s1592_s18   ;;  %s1296_s17 = sphi %s1351_s17, %s1591_s17   ;;  %s1292_s16 = sphi %s1349_s16, %s1590_s16   ;;  %s1288_s15 = sphi %s1347_s15, %s1589_s15  }
   0x5   : > { %s29_s23 = sadd.s32 1, %s1304_s19  ;;  %s127_s24 = sadd.s32 1, %s1296_s17 }
   0x6   : > { %p31_p0 = scmp.ge.s32.totalorder %s29_s23, 2  ;;  %p137_p1 = scmp.ne.s32.totalorder %s1296_s17, %s1292_s16 }
   0x7   : > { %p138_p2 = scmp.eq.s32.totalorder %s1081_s21, 1  ;;  %p143_p3 = scmp.ne.s32.totalorder %s1292_s16, %s1288_s15 }
   0x8   : > { %s1595_s23 = smov (%p31_p0, %s29_s23), 0  ;;  %p144_p5 = scmp.eq.s32.totalorder %s1082_s22, 1 }
   0x9   : > { %p1387_p4 = por %p138_p2, %p137_p1  ;;  %s122_s26 = ssub.s32 %s1304_s19, %s1595_s23 }
   0xa   : > { %p1085_p6 = scmp.ge.s32.totalorder %s1308_s20, 1  ;;  %p125_p7 = scmp.eq.s32.totalorder %s122_s26, 0 }
   0xb   : > { %p1394_p8 = por %p144_p5, %p143_p3  ;;  %p179_p9 = scmp.lt.s32.totalorder %s1308_s20, 3 }
   0xc   : > { %s1400_s28 = scalar_select %p125_p7, %s1296_s17, %s127_s24  }
   0xd   : > { %p180_p10 = pnand %p1085_p6, %p179_p9 }
   0xe   : > { %v241_v0 = vlaneseq (!%p180_p10)  ;;  %v1310_v1 = vmov (!%p180_p10), 1983009808   ;;  %p205_p11 = scmp.lt.s32.totalorder (!%p180_p10), %s1300_s18, 1  ;;  %v1311_v3 = vmov (!%p180_p10), 0   ;;  %v1312_v10 = vmov (!%p180_p10), 0.0   ;;  %s1313_s8 = smov (!%p180_p10), 111  }
   0xf   : > { %183 = sbr.rel (%p180_p10) target bundleno = 533 (0x215), region = 36  ;;  %v289_v2 = vunpack.c.l.s4 (!%p180_p10), %v1310_v1  ;;  %216 = vst [vmem:[#allocation2] sm:$0xff] (!%p180_p10), %v1311_v3  ;;  %685 = vmatprep.mubr.bf16.mxu0 (!%p180_p10), %v1311_v3  ;;  %373 = vmatprep.mubr.bf16.mxu1 (!%p180_p10), %v1311_v3  ;;  %s1314_s9 = smov (!%p180_p10), 127   ;;  %vm334_vm4 = vcmask (!%p180_p10), 1041408   ;;  %vm330_vm5 = vcmask (!%p180_p10), 31744   ;;  %vm298_vm6 = vcmask (!%p180_p10), 908288  }
  0x10   : > { %v242_v4 = vand.u32 (!%p180_p10), 127, %v241_v0  ;;  %1226 = vset.pattern.permute.xlu1 (!%p180_p10), %v1311_v3  ;;  %1227 = vset.pattern.permute.xlu0 (!%p180_p10), %v1311_v3  ;;  %v292_v8 = vshrl.u32 (!%p180_p10), %v241_v0, 7  ;;  %s1315_s10 = smov (!%p180_p10), 113   ;;  %s1316_s11 = smov (!%p180_p10), 16   ;;  %v1108_v29 = vld [vmem:[%s1583_s1 + $0x10] sm:$0xf] (!%p180_p10) }
  0x11   : > { %v290_v7 = vunpack.c.0.s8 (!%p180_p10), %v289_v2  ;;  %vm473_vm7 = vcmask (!%p180_p10), 924672   ;;  %s1317_s14 = smov (!%p180_p10), 17   ;;  %vm560_vm8 = vcmask (!%p180_p10), 1039360   ;;  %vm327_vm9 = vcmask (!%p180_p10), 130048   ;;  %s1318_s21 = smov (!%p180_p10), 15  }
  0x12   : > { %v243_v5 = vadd.s32 (!%p180_p10), 128, %v242_v4  ;;  %v248_v6 = vand.u32 (!%p180_p10), 15, %v242_v4  ;;  %v1096_v63 = vld [vmem:[%s1583_s1 + $0x4] sm:$0xf] (!%p180_p10)  ;;  %s1319_s26 = smov (!%p180_p10), 112   ;;  %s1320_s5 = smov (!%p180_p10), 1  }
  0x13   : > { %v1412_v14 = vsub.s32 (!%p180_p10), %v290_v7, %v292_v8  ;;  %v1111_v2 = vld [vmem:[%s1583_s1 + $0x14] sm:$0xf] (!%p180_p10)  ;;  %vm405_vm10 = vcmask (!%p180_p10), 138240   ;;  %vm500_vm11 = vcmask (!%p180_p10), 121856   ;;  %vm847_vm12 = vcmask (!%p180_p10), 916480   ;;  %s202_s6 = sand.u32 (!%p180_p10), 1, %s1292_s16  }
  0x14   : > { %v255_v9 = vand.u32 (!%p180_p10), 15, %v243_v5  ;;  %vm268_vm0 = vcmp.ge.s32.totalorder (!%p180_p10), %v248_v6, 1  ;;  %vm276_vm1 = vcmp.lt.s32.totalorder (!%p180_p10), %v248_v6, 15  ;;  %vm587_vm13 = vcmask (!%p180_p10), 7168  }
  0x15   : > { %v1091_v11 = vsel (!%p180_p10), %vm268_vm0, 1.0, %v1312_v10  ;;  %v1093_v12 = vsel (!%p180_p10), %vm276_vm1, 1.0, %v1312_v10 }
  0x16   : > { %s206_s29 = scalar_select %p205_p11, %s1300_s18, 1  ;;  %vm269_vm2 = vcmp.ge.s32.totalorder %v255_v9, 1  ;;  %vm277_vm3 = vcmp.lt.s32.totalorder %v255_v9, 15 }
  0x17   : > { %v1092_v16 = vsel %vm269_vm2, 1.0, %v1312_v10  ;;  %v1094_v17 = vsel %vm277_vm3, 1.0, %v1312_v10 }
  0x18   : > { %s1128_s30 = sshll.u32 %s206_s29, 3  ;;  %v1095_v18 = vpack.c.bf16 %v1092_v16, %v1091_v11  ;;  %v1102_v19 = vpack.c.bf16 %v1094_v17, %v1093_v12  ;;  %v1114_v17 = vld [vmem:[%s1583_s1 + $0x18] sm:$0xf] }
  0x19   : > { %s209_s7 = scalar_lea.vmem %s1582_s0, %s1128_s30 }
  0x1a   : > { %v217_v13 = vld [vmem:[%s209_s7] sm:$0xff]  ;;  %v1415_v21 = vrot.slane %v1095_v18, %v1412_v14  ;;  %v1420_v22 = vrot.slane %v1102_v19, %v1412_v14  ;;  %s1086_s7 = sshll.u32 %s202_s6, 4 }
  0x1b   : > { %v219_v15 = vcombine.high %v217_v13, %v217_v13  ;;  %v972_v18 = vld [vmem:[%s1584_s2] sm:$0xff] }
  0x1c   : > { %295 = vrot.lane.b32.xlu0 %v1415_v21, %s1313_s8  ;;  %557 = vrot.lane.b32.xlu1 %v1415_v21, %s1314_s9  ;;  %v980_v19 = vld [vmem:[%s1585_s3] sm:$0xff] }
  0x1d   : > { %v1089_v20 = vpack.c.bf16 %v219_v15, %v217_v13 }
  0x1f   : > { %1090 = vst.sshfl [vmem:[#allocation2 + $0x2] sm:$0x33 pattern:$0x76325410] %v1089_v20 }
  0x20   : > { %470 = vrot.lane.b32.xlu0 %v1420_v22, %s1315_s10 }
  0x26   : > { %v1424_v23 = vld [vmem:[#allocation2] sm:$0xff] }
  0x27   : > { %698 = vrot.lane.b32.xlu1 %v1424_v23, %s1314_s9  ;;  %v312_v24 = vrot.slane %v1424_v23, %v1412_v14  ;;  %v305_v25 = vcombine.high %v1424_v23, %v1424_v23  ;;  %s1129_s9 = sshll.u32 %s1300_s18, 8  ;;  %s1321_s18 = smov [#allocation3]  }
  0x28   : > { %s1535_s13 = scalar_lea.hbm %s1586_s4, %s1129_s9  ;;  %s1234_s22 = sshll.u32 %s1321_s18, 4  ;;  %s1235_s22 = int_to_ptr.vmem [resolvable:$false] %s1234_s22 }
  0x29   : > { %321 = vrot.lane.b32.xlu0 %v312_v24, %s1316_s11  ;;  %v320_v26 = vcombine.high %v312_v24, %v312_v24  ;;  %v1432_v27 = vrot.slane %v305_v25, %v1412_v14  ;;  %s1236_s24 = scalar_lea.vmem %s1235_s22, 512 }
  0x2b   : > { %323 = vrot.lane.b32.xlu1 %v320_v26, %s1316_s11  ;;  %1109 = vmatprep.subr.msk.bf16.mxu0 %vm334_vm4, %v1432_v27  ;;  %v648_v28 = vsel %vm334_vm4, %v320_v26, 0  ;;  %v840_v8 = vcombine.high %v1432_v27, %v1432_v27 }
  0x2c   : > { %654 = vmatpush1.bf16.msra.mxu0 %v648_v28  ;;  %v284_v28 = vld [vmem:[%s1583_s1] sm:$0xf] }
  0x2d   : > { %325 = vrot.lane.b32.xlu0 %v1432_v27, %s1316_s11 }
  0x2f   : > { %769 = vrot.lane.b32.xlu1 %v1424_v23, %s1315_s10  ;;  %1110 = vmatmul.mubr.msk.bf16.vlgmr.msra.gmra.mrb[0].mxu0 %vm330_vm5, %v1108_v29  ;;  %s204_s10 = scalar_lea.vmem [#allocation3], %s1086_s7 }
  0x30   : > { %756 = vmatprep.mubr.bf16.mxu0 %v1311_v3 }
  0x8e   : > { %v296_v30 = vpop.permute.xlu0 %295  ;;  %v558_v32 = vpop.permute.xlu1 %557 }
  0x8f   : > { %v297_v31 = vrot.slane %v296_v30, 6  ;;  %v559_v51 = vrot.slane %v558_v32, 6 }
  0x91   : > { %v299_v33 = vsel %vm298_vm6, %v297_v31, %v296_v30  ;;  %v561_v60 = vsel %vm560_vm8, %v559_v51, %v558_v32 }
  0x92   : > { %v301_v34 = vmul.bf16 %v299_v33, %v1424_v23  ;;  %v471_v35 = vpop.permute.xlu0 %470  ;;  %v563_v4 = vmul.bf16 %v561_v60, %v1424_v23 }
  0x93   : > { %v472_v36 = vrot.slane %v471_v35, 6 }
  0x94   : > { %v383_v37 = vcombine.high %v301_v34, %v301_v34  ;;  %v390_v38 = vrot.slane %v301_v34, %v1412_v14  ;;  %v572_v10 = vrot.slane %v563_v4, %v1412_v14  ;;  %v565_v13 = vcombine.high %v563_v4, %v563_v4 }
  0x95   : > { %v474_v40 = vsel %vm473_vm7, %v472_v36, %v471_v35 }
  0x96   : > { %v476_v43 = vmul.bf16 %v474_v40, %v1424_v23  ;;  %399 = vrot.lane.b32.xlu0 %v390_v38, %s1317_s14  ;;  %v398_v44 = vcombine.high %v390_v38, %v390_v38  ;;  %v397_v47 = vrot.slane %v383_v37, %v1412_v14  ;;  %v580_v15 = vcombine.high %v572_v10, %v572_v10 }
  0x97   : > { %v579_v16 = vrot.slane %v565_v13, %v1412_v14 }
  0x98   : > { %401 = vrot.lane.b32.xlu1 %v398_v44, %s1317_s14  ;;  %v485_v48 = vrot.slane %v476_v43, %v1412_v14  ;;  %v478_v0 = vcombine.high %v476_v43, %v476_v43  ;;  %v1101_v43 = vld [vmem:[%s1583_s1 + $0x8] sm:$0xf]  ;;  %v1117_v44 = vld [vmem:[%s1583_s1 + $0x1c] sm:$0xf] }
  0x99   : > { %v699_v39 = vpop.permute.xlu1 %698 }
  0x9a   : > { %v700_v41 = vrot.slane %v699_v39, 2  ;;  %v701_v42 = vrot.slane %v699_v39, 4  ;;  %403 = vrot.lane.b32.xlu0 %v397_v47, %s1317_s14  ;;  %v493_v5 = vcombine.high %v485_v48, %v485_v48  ;;  %v492_v7 = vrot.slane %v478_v0, %v1412_v14  ;;  %s993_s14 = scalar_lea.sflag [#allocation4], %s202_s6 }
  0x9b   : > { %v322_v45 = vpop.permute.xlu0 %321 }
  0x9c   : > { %v702_v46 = vsel %vm560_vm8, %v700_v41, %v701_v42  ;;  %494 = vrot.lane.b32.xlu1 %v485_v48, %s1318_s21 }
  0x9d   : > { %v705_v49 = vmul.bf16 %v702_v46, %v1420_v22  ;;  %v324_v50 = vpop.permute.xlu1 %323 }
  0x9e   : > { %v328_v52 = vsel %vm327_vm9, %v322_v45, %v324_v50  ;;  %841 = vrot.lane.b32.xlu0 %v320_v26, %s1319_s26 }
  0x9f   : > { %v713_v53 = vrot.slane %v705_v49, %v1412_v14  ;;  %v326_v54 = vpop.permute.xlu0 %325  ;;  %v336_v55 = vsel %vm334_vm4, %v328_v52, 0 }
  0xa0   : > { %v329_v56 = vsel %vm327_vm9, %v324_v50, %v326_v54  ;;  %843 = vrot.lane.b32.xlu1 %v1432_v27, %s1319_s26 }
  0xa1   : > { %v714_v57 = vcombine.high %v713_v53, %v713_v53  ;;  %v719_v58 = vsel %vm334_vm4, %v713_v53, 0  ;;  %v770_v59 = vpop.permute.xlu1 %769  ;;  %1097 = vmatprep.subr.msk.bf16.mxu1 %vm334_vm4, %v329_v56 }
  0xa2   : > { %v771_v61 = vrot.slane %v770_v59, 2  ;;  %v772_v62 = vrot.slane %v770_v59, 4  ;;  %342 = vmatpush1.bf16.msra.mxu1 %v336_v55  ;;  %496 = vrot.lane.b32.xlu0 %v493_v5, %s1318_s21  ;;  %v1105_v55 = vld [vmem:[%s1583_s1 + $0xc] sm:$0xf] }
  0xa3   : > { %1112 = vmatprep.subr.msk.bf16.mxu0 %vm334_vm4, %v714_v57 }
  0xa4   : > { %725 = vmatpush1.bf16.msra.mxu0 %v719_v58  ;;  %v773_v1 = vsel %vm473_vm7, %v771_v61, %v772_v62  ;;  %498 = vrot.lane.b32.xlu1 %v492_v7, %s1318_s21 }
  0xa5   : > { %v776_v6 = vmul.bf16 %v773_v1, %v1415_v21  ;;  %1098 = vmatmul.mubr.msk.bf16.vlgmr.msra.gmra.mrb[0].mxu1 %vm330_vm5, %v1096_v63 }
  0xa6   : > { %449 = vmatprep.mubr.bf16.mxu1 %v1311_v3  ;;  %845 = vrot.lane.b32.xlu0 %v840_v8, %s1319_s26 }
  0xa7   : > { %v784_v9 = vrot.slane %v776_v6, %v1412_v14  ;;  %1113 = vmatmul.mubr.msk.bf16.vlgmr.msra.gmra.mrb[0].mxu0 %vm330_vm5, %v1111_v2 }
  0xa8   : > { %827 = vmatprep.mubr.bf16.mxu0 %v1311_v3  ;;  %904 = vrot.lane.b32.xlu1 %v1424_v23, %s1313_s8  ;;  %s1009_s8 = sshll.u32 %s204_s10, 4  ;;  %s1537_s8 = int_to_ptr.vmem [resolvable:$true] %s1009_s8 }
  0xa9   : > { %v785_v11 = vcombine.high %v784_v9, %v784_v9  ;;  %v790_v12 = vsel %vm334_vm4, %v784_v9, 0  ;;  %s1230_s21 = scalar_lea.vmem %s1537_s8, 256  ;;  %p1237_p1 = scmp.lt.s32.totalorder %s1537_s8, %s1235_s22 }
  0xaa   : > { %581 = vrot.lane.b32.xlu0 %v572_v10, %s1320_s5  ;;  %p1231_p12 = scmp.ne.s32.totalorder %s1537_s8, %s1230_s21  ;;  %p1238_p2 = scmp.lt.s32.totalorder %s1236_s24, %s1230_s21 }
  0xab   : > { %1115 = vmatprep.subr.msk.bf16.mxu0 %vm334_vm4, %v785_v11 }
  0xac   : > { %796 = vmatpush1.bf16.msra.mxu0 %v790_v12  ;;  %583 = vrot.lane.b32.xlu1 %v580_v15, %s1320_s5  ;;  %p1232_p13 = pnand %p1231_p12, %p1387_p4  ;;  %p1239_p3 = por %p1238_p2, %p1237_p1 }
  0xae   : > { %585 = vrot.lane.b32.xlu0 %v579_v16, %s1320_s5  ;;  %p1233_p0 = pneg %p1232_p13 }
  0xb0   : > { %975 = vperm.xlu1 %1226, %v972_v18   ;;  %p1240_p5 = pnand %p1239_p3, %p1233_p0 }
  0xb2   : > { %983 = vperm.xlu0 %1227, %v980_v19  }
  0xb3   : > { %1116 = vmatmul.mubr.msk.bf16.vlgmr.msra.gmra.mrb[0].mxu0 %vm330_vm5, %v1114_v17 }
  0xb4   : > { %891 = vmatprep.mubr.bf16.mxu0 %v1311_v3 }
 0x108   : > { %v400_v20 = vpop.permute.xlu0 %399 }
 0x10a   : > { %v402_v21 = vpop.permute.xlu1 %401 }
 0x10b   : > { %v406_v23 = vsel %vm405_vm10, %v400_v20, %v402_v21 }
 0x10c   : > { %v404_v24 = vpop.permute.xlu0 %403  ;;  %v412_v26 = vsel %vm334_vm4, %v406_v23, 0 }
 0x10d   : > { %v407_v25 = vsel %vm405_vm10, %v402_v21, %v404_v24 }
 0x10e   : > { %v495_v27 = vpop.permute.xlu1 %494  ;;  %1099 = vmatprep.subr.msk.bf16.mxu1 %vm334_vm4, %v407_v25 }
 0x10f   : > { %418 = vmatpush1.bf16.msra.mxu1 %v412_v26 }
 0x110   : > { %v842_v29 = vpop.permute.xlu0 %841 }
 0x112   : > { %v844_v30 = vpop.permute.xlu1 %843  ;;  %1100 = vmatmul.mubr.msk.bf16.vlgmr.msra.gmra.mrb[0].mxu1 %vm330_vm5, %v284_v28 }
 0x113   : > { %544 = vmatprep.mubr.bf16.mxu1 %v1311_v3  ;;  %v848_v34 = vsel %vm847_vm12, %v842_v29, %v844_v30 }
 0x114   : > { %v497_v31 = vpop.permute.xlu0 %496  ;;  %v854_v39 = vsel %vm334_vm4, %v848_v34, 0 }
 0x115   : > { %v501_v32 = vsel %vm500_vm11, %v495_v27, %v497_v31 }
 0x116   : > { %v499_v33 = vpop.permute.xlu1 %498  ;;  %v507_v36 = vsel %vm334_vm4, %v501_v32, 0 }
 0x117   : > { %v502_v35 = vsel %vm500_vm11, %v497_v31, %v499_v33 }
 0x118   : > { %1103 = vmatprep.subr.msk.bf16.mxu1 %vm334_vm4, %v502_v35  ;;  %v846_v37 = vpop.permute.xlu0 %845 }
 0x119   : > { %v849_v38 = vsel %vm847_vm12, %v844_v30, %v846_v37  ;;  %513 = vmatpush1.bf16.msra.mxu1 %v507_v36 }
 0x11a   : > { %v905_v40 = vpop.permute.xlu1 %904  ;;  %1118 = vmatprep.subr.msk.bf16.mxu0 %vm334_vm4, %v849_v38 }
 0x11b   : > { %v906_v41 = vrot.slane %v905_v40, 2  ;;  %v907_v42 = vrot.slane %v905_v40, 4  ;;  %860 = vmatpush1.bf16.msra.mxu0 %v854_v39 }
 0x11c   : > { %v582_v45 = vpop.permute.xlu0 %581 }
 0x11d   : > { %v908_v46 = vsel %vm298_vm6, %v906_v41, %v907_v42 }
 0x11e   : > { %v910_v47 = vmul.bf16 %v908_v46, %v1420_v22  ;;  %v584_v48 = vpop.permute.xlu1 %583  ;;  %1104 = vmatmul.mubr.msk.bf16.vlgmr.msra.gmra.mrb[0].mxu1 %vm330_vm5, %v1101_v43  ;;  %1119 = vmatmul.mubr.msk.bf16.vlgmr.msra.gmra.mrb[0].mxu0 %vm330_vm5, %v1117_v44 }
 0x11f   : > { %v588_v49 = vsel %vm587_vm13, %v582_v45, %v584_v48  ;;  %631 = vmatprep.mubr.bf16.mxu1 %v1311_v3  ;;  %961 = vmatprep.mubr.bf16.mxu0 %v1311_v3  ;;  %v1120_v3 = vld [vmem:[%s1583_s1 + $0x20] sm:$0xf] }
 0x120   : > { %v918_v50 = vrot.slane %v910_v47, %v1412_v14  ;;  %v586_v51 = vpop.permute.xlu0 %585  ;;  %v594_v53 = vsel %vm334_vm4, %v588_v49, 0 }
 0x121   : > { %v589_v52 = vsel %vm587_vm13, %v584_v48, %v586_v51 }
 0x122   : > { %1106 = vmatprep.subr.msk.bf16.mxu1 %vm334_vm4, %v589_v52  ;;  %v919_v22 = vcombine.high %v918_v50, %v918_v50  ;;  %v924_v54 = vsel %vm334_vm4, %v918_v50, 0 }
 0x123   : > { %600 = vmatpush1.bf16.msra.mxu1 %v594_v53 }
 0x124   : > { %1121 = vmatprep.subr.msk.bf16.mxu0 %vm334_vm4, %v919_v22 }
 0x125   : > { %930 = vmatpush1.bf16.msra.mxu0 %v924_v54 }
 0x12a   : > { %1107 = vmatmul.mubr.msk.bf16.vlgmr.msra.gmra.mrb[0].mxu1 %vm330_vm5, %v1105_v55  ;;  %1122 = vmatmul.mubr.msk.bf16.vlgmr.msra.gmra.mrb[0].mxu0 %vm330_vm5, %v1120_v3 }
 0x12f   : > { %v976_v14 = vpop.permute.xlu1 %975 }
 0x131   : > { %v984_v56 = vpop.permute.xlu0 %983 }
 0x1fd   : > { %v633_v57 = vpop.f32.mrb[0].mxu1  ;;  %v963_v58 = vpop.f32.mrb[0].mxu0 }
 0x1fe   : > { %v1130_v59 = vadd.f32 %v963_v58, %v633_v57  ;;  %v635_v60 = vpop.f32.mrb[1].mxu1  ;;  %v965_v61 = vpop.f32.mrb[1].mxu0 }
 0x1ff   : > { %v1131_v62 = vadd.f32 %v965_v61, %v635_v60  ;;  %v637_v63 = vpop.f32.mrb[2].mxu1  ;;  %v967_v0 = vpop.f32.mrb[2].mxu0 }
 0x200   : > { %v978_v1 = vmul.f32 %v1130_v59, %v976_v14  ;;  %v638_v2 = vpop.f32.mrb[3].mxu1  ;;  %v968_v4 = vpop.f32.mrb[3].mxu0 }
 0x201   : > { %v979_v5 = vmul.f32 %v1131_v62, %v976_v14 }
 0x202   : > { %v986_v6 = vadd.f32 %v984_v56, %v978_v1 }
 0x203   : > { %v987_v7 = vadd.f32 %v984_v56, %v979_v5 }
 0x204   : > { %v988_v8 = vmax.f32 %v986_v6, 0.0 }
 0x205   : > { %v989_v9 = vmax.f32 %v987_v7, 0.0 }
 0x206   : > { %990 = vst [vmem:[%s204_s10] sm:$0xff] %v988_v8 }
 0x207   : > { %991 = vst [vmem:[%s204_s10 + $0x8] sm:$0xff] %v989_v9 }
 0x208   : > { %1243 = shalt.err (!%p1240_p5)
}
 0x209   : > { %s1244_s26 = scalar_lea.hbm %s1535_s13, 256  ;;  %s1248_s5 = scalar_lea.hbm %s1586_s4, 512 }
 0x20a   : > { %p1245_p6 = scmp.ne.s32.totalorder %s1535_s13, %s1244_s26  ;;  %p1249_p10 = scmp.lt.u32.totalorder %s1535_s13, %s1586_s4 }
 0x20b   : > { %p1250_p11 = scmp.lt.u32.totalorder %s1248_s5, %s1244_s26  ;;  %p1252_p13 = scmp.lt.u32.totalorder %s1244_s26, %s1535_s13 }
 0x20c   : > { %p1246_p7 = pnand %p1245_p6, %p1387_p4 }
 0x20d   : > { %p1251_p12 = por %p1250_p11, %p1249_p10 }
 0x20e   : > { %p1247_p9 = pneg %p1246_p7 }
 0x20f   : > { %p1253_p0 = por %p1252_p13, %p1251_p12 }
 0x211   : > { %p1254_p1 = pnand %p1253_p0, %p1247_p9 }
 0x213   : > { %1257 = shalt.err (!%p1254_p1)
}
 0x214   : > { %1160 = dma.vmem_to_hbm [thread:$0]  (%p1387_p4), %s1537_s8, 256, %s1535_s13, %s993_s14  }
 0x215 PF: > { %p1166_p2 = scmp.ge.s32.totalorder %s1308_s20, 2  ;;  %s1021_s9 = sand.u32 1, %s1288_s15  }
 0x216   : > { %s1022_s10 = scalar_lea.sflag [#allocation4], %s1021_s9 }
 0x217   : > { %p1163_p3 = pnand %p1166_p2, %p1394_p8 }
 0x219   : > { %1283 = dma.done.wait (!%p1163_p3), %s1022_s10, 256  }
 0x21a   : > { %1285 = vsyncadd (!%p1163_p3), %s1022_s10, 4294967040  ;;  %s17_s20 = sadd.s32 1, %s1308_s20   ;;  %s1589_s15 = smov %s1292_s16 }
 0x21b   : > { %p14_p5 = scmp.ge.s32.totalorder %s17_s20, 4   ;;  %s1590_s16 = smov %s1296_s17 }
 0x21c   : > { %s1591_s17 = smov %s1400_s28  ;;  %s1592_s18 = smov %s1304_s19 }
 0x21d   : > { %s1593_s19 = smov %s1595_s23  ;;  %16 = sbr.rel (!%p14_p5) target bundleno = 4 (0x4), region = 84 }
 0x224   :  { %1027 = vsyncpa [#allocation4], 1 }
 0x225   :  { %1029 = vsyncpa [#allocation4 + $0x1], 1 }

</bundles_post_ra>
